<compile_context>
chip_gen: v6e
topology: v6e:2x2x1
jax: 0.10.0
libtpu: 0.0.40
codegen_flags: <defaults>
</compile_context>

<pallas_src>
import functools
import math

import jax
import jax.numpy as jnp
from jax.experimental import pallas as pl
from jax.experimental.pallas import tpu as pltpu

_INV_SQRT2 = 1.0 / math.sqrt(2.0)

# Abramowitz & Stegun 7.1.26:  erfc(z) ~= (a1 t + ... + a5 t^5) * exp(-z^2),
# t = 1/(1 + p z), z >= 0, max abs error 1.5e-7.
_P = 0.3275911
_A1 = 0.254829592
_A2 = -0.284496736
_A3 = 1.421413741
_A4 = -1.453152027
_A5 = 1.061405429

_LANES = 128


def _gelu_kernel(x_ref, o_ref):
    # Compute in f32 (VPU muls/adds; exp + reciprocal seed on the EUP).
    x = x_ref[...].astype(jnp.float32)
    z = jnp.abs(x) * _INV_SQRT2

    d = 1.0 + _P * z
    r = pl.reciprocal(d, approx=True)      # EUP seed
    r = r * (2.0 - d * r)                  # Newton refine -> ~f32 accuracy
    r = r * (2.0 - d * r)

    poly = r * (_A1 + r * (_A2 + r * (_A3 + r * (_A4 + r * _A5))))
    erfc_z = poly * jnp.exp(-(z * z))      # exp on EUP

    c = (0.5 * erfc_z) * x                 # 0.5 * x * erfc(|x|/sqrt(2))
    # x >= 0: gelu = x - c ;  x < 0: gelu = c   (no 1 - erf cancellation)
    o_ref[...] = jnp.where(x >= 0.0, x - c, c).astype(o_ref.dtype)


def _gelu_reference(x):
    # Exact-erf formula (used for the ragged-shape fallback and for testing).
    return x * 0.5 * (1.0 + jax.lax.erf(x * _INV_SQRT2))


def _round_up(v, m):
    return ((v + m - 1) // m) * m


@functools.lru_cache(maxsize=1)
def _target_block_bytes():
    # v5e (and older / unknown): 2 MiB blocks -> 8 MiB double-buffered in+out,
    # inside the 16 MiB default scoped-VMEM limit.  v6e/v7x: 4 MiB blocks
    # (16 MiB footprint, under their 32 MiB default) to amortize the ~0.35 us
    # per-grid-step overhead at 1.4-3.2 TB/s.
    try:
        kind = jax.devices()[0].device_kind.lower()
    except Exception:
        return 2 * 1024 * 1024
    if ("v6" in kind) or ("v7" in kind) or ("7x" in kind):
        return 4 * 1024 * 1024
    return 2 * 1024 * 1024


@jax.jit
def gelu(x: jax.Array) -> jax.Array:
    """GELU matching torch's default: x * 0.5 * (1 + erf(x / sqrt(2)))."""
    orig_shape = x.shape
    dtype = x.dtype
    n = x.size
    if n == 0:
        return x

    if n % _LANES != 0:
        # Ragged size: a lane-dense reshape would need a pad + trailing slice
        # (two extra full HBM passes).  A fused XLA elementwise op is already
        # at the HBM roofline here, so just use it.
        return _gelu_reference(x)

    itemsize = jnp.dtype(dtype).itemsize
    rows = n // _LANES
    x2d = jnp.reshape(x, (rows, _LANES))   # contiguous -> layout no-op under jit

    # Packed-sublane multiple: 8 rows for 4-byte, 16 for 2-byte, 32 for 1-byte.
    sub = 8 * max(1, 4 // itemsize)
    max_tile_rows = max(
        sub, (_target_block_bytes() // (_LANES * itemsize)) // sub * sub
    )

    if rows <= sub:
        tile_rows = rows                   # single full-extent block
    else:
        tile_rows = min(max_tile_rows, _round_up(rows, sub))
        if pl.cdiv(rows, tile_rows) < 2:
            # Keep >= 2 grid steps: lets the "parallel" axis use both v7x
            # TensorCores and gives the DMA pipeline overlap.
            tile_rows = max(sub, _round_up(pl.cdiv(rows, 2), sub))
    grid = (pl.cdiv(rows, tile_rows),)

    cost = pl.CostEstimate(
        flops=20 * n,
        transcendentals=2 * n,
        bytes_accessed=2 * n * itemsize,
    )

    out2d = pl.pallas_call(
        _gelu_kernel,
        out_shape=jax.ShapeDtypeStruct((rows, _LANES), dtype),
        grid=grid,
        in_specs=[pl.BlockSpec((tile_rows, _LANES), lambda i: (i, 0))],
        out_specs=pl.BlockSpec((tile_rows, _LANES), lambda i: (i, 0)),
        compiler_params=pltpu.CompilerParams(
            dimension_semantics=("parallel",),
        ),
        cost_estimate=cost,
    )(x2d)

    return out2d.reshape(orig_shape)


if __name__ == "__main__":
    # Small NCHW-style input, consistent with typical use of this activation.
    key = jax.random.PRNGKey(0)
    x = jax.random.normal(key, (2, 4, 16, 16), dtype=jnp.float32)

    y = gelu(x)
    jax.block_until_ready(y)

    y_ref = _gelu_reference(x)
    assert y.shape == x.shape and y.dtype == x.dtype
    assert jnp.allclose(y, y_ref, atol=2e-6, rtol=2e-6), float(
        jnp.max(jnp.abs(y - y_ref))
    )

    # Larger f32 input -> multi-step grid path.
    xl = jax.random.normal(jax.random.PRNGKey(1), (16, 64, 128), dtype=jnp.float32)
    yl = gelu(xl)
    jax.block_until_ready(yl)
    assert jnp.allclose(yl, _gelu_reference(xl), atol=2e-6, rtol=2e-6)

    # bf16 input (packed-sublane tile rounding path).
    xb = jax.random.normal(jax.random.PRNGKey(2), (8, 16, 128), dtype=jnp.bfloat16)
    yb = gelu(xb)
    jax.block_until_ready(yb)
    assert yb.dtype == jnp.bfloat16
    assert jnp.allclose(
        yb.astype(jnp.float32),
        _gelu_reference(xb.astype(jnp.float32)),
        atol=2e-2,
        rtol=2e-2,
    )

    # Ragged size -> fused XLA fallback path (no pad/slice HBM passes).
    xr = jax.random.normal(jax.random.PRNGKey(3), (5, 7), dtype=jnp.float32)
    yr = gelu(xr)
    jax.block_until_ready(yr)
    assert jnp.allclose(yr, _gelu_reference(xr), atol=2e-6, rtol=2e-6)

    print("KERNEL_OK")
</pallas_src>

<mosaic_0001>
module attributes {stable_mosaic.version = 11 : i64} {
  func.func @_gelu_kernel(%arg0: i32, %arg1: memref<8x128xf32, #tpu.memory_space<vmem>>, %arg2: memref<8x128xf32, #tpu.memory_space<vmem>>) attributes {dimension_semantics = [#tpu.dimension_semantics<parallel>], iteration_bounds = array<i64: 2>, scalar_prefetch = 0 : i64, scratch_operands = 0 : i64, tpu.core_type = #tpu.core_type<tc>, window_params = [{transform_indices = @transform_0, window_bounds = array<i64: 8, 128>}, {transform_indices = @transform_1, window_bounds = array<i64: 8, 128>}]} {
    %c0 = arith.constant 0 : index
    %c0_0 = arith.constant 0 : index
    %0 = vector.load %arg1[%c0, %c0_0] : memref<8x128xf32, #tpu.memory_space<vmem>>, vector<8x128xf32>
    %1 = math.absf %0 : vector<8x128xf32>
    %cst = arith.constant 0.707106769 : f32
    %2 = vector.broadcast %cst : f32 to vector<8x128xf32>
    %3 = arith.mulf %1, %2 : vector<8x128xf32>
    %cst_1 = arith.constant 0.327591091 : f32
    %4 = vector.broadcast %cst_1 : f32 to vector<8x128xf32>
    %5 = arith.mulf %4, %3 : vector<8x128xf32>
    %cst_2 = arith.constant 1.000000e+00 : f32
    %6 = vector.broadcast %cst_2 : f32 to vector<8x128xf32>
    %7 = arith.addf %6, %5 : vector<8x128xf32>
    %8 = tpu.reciprocal %7 {approx = true} : vector<8x128xf32> -> vector<8x128xf32>
    %9 = arith.mulf %7, %8 : vector<8x128xf32>
    %cst_3 = arith.constant 2.000000e+00 : f32
    %10 = vector.broadcast %cst_3 : f32 to vector<8x128xf32>
    %11 = arith.subf %10, %9 : vector<8x128xf32>
    %12 = arith.mulf %8, %11 : vector<8x128xf32>
    %13 = arith.mulf %7, %12 : vector<8x128xf32>
    %cst_4 = arith.constant 2.000000e+00 : f32
    %14 = vector.broadcast %cst_4 : f32 to vector<8x128xf32>
    %15 = arith.subf %14, %13 : vector<8x128xf32>
    %16 = arith.mulf %12, %15 : vector<8x128xf32>
    %cst_5 = arith.constant 1.06140542 : f32
    %17 = vector.broadcast %cst_5 : f32 to vector<8x128xf32>
    %18 = arith.mulf %16, %17 : vector<8x128xf32>
    %cst_6 = arith.constant -1.45315206 : f32
    %19 = vector.broadcast %cst_6 : f32 to vector<8x128xf32>
    %20 = arith.addf %19, %18 : vector<8x128xf32>
    %21 = arith.mulf %16, %20 : vector<8x128xf32>
    %cst_7 = arith.constant 1.42141378 : f32
    %22 = vector.broadcast %cst_7 : f32 to vector<8x128xf32>
    %23 = arith.addf %22, %21 : vector<8x128xf32>
    %24 = arith.mulf %16, %23 : vector<8x128xf32>
    %cst_8 = arith.constant -0.284496725 : f32
    %25 = vector.broadcast %cst_8 : f32 to vector<8x128xf32>
    %26 = arith.addf %25, %24 : vector<8x128xf32>
    %27 = arith.mulf %16, %26 : vector<8x128xf32>
    %cst_9 = arith.constant 0.254829586 : f32
    %28 = vector.broadcast %cst_9 : f32 to vector<8x128xf32>
    %29 = arith.addf %28, %27 : vector<8x128xf32>
    %30 = arith.mulf %16, %29 : vector<8x128xf32>
    %31 = arith.mulf %3, %3 : vector<8x128xf32>
    %cst_10 = arith.constant 0.000000e+00 : f32
    %32 = vector.broadcast %cst_10 : f32 to vector<8x128xf32>
    %33 = arith.subf %32, %31 : vector<8x128xf32>
    %34 = math.exp %33 : vector<8x128xf32>
    %35 = arith.mulf %30, %34 : vector<8x128xf32>
    %cst_11 = arith.constant 5.000000e-01 : f32
    %36 = vector.broadcast %cst_11 : f32 to vector<8x128xf32>
    %37 = arith.mulf %36, %35 : vector<8x128xf32>
    %38 = arith.mulf %37, %0 : vector<8x128xf32>
    %cst_12 = arith.constant 0.000000e+00 : f32
    %39 = vector.broadcast %cst_12 : f32 to vector<8x128xf32>
    %40 = arith.cmpf oge, %0, %39 : vector<8x128xf32>
    %41 = arith.subf %0, %38 : vector<8x128xf32>
    %42 = arith.select %40, %41, %38 : vector<8x128xi1>, vector<8x128xf32>
    %c0_13 = arith.constant 0 : index
    %c0_14 = arith.constant 0 : index
    %43 = vector.load %arg2[%c0_13, %c0_14] : memref<8x128xf32, #tpu.memory_space<vmem>>, vector<8x128xf32>
    tpu.vector_store %arg2[%c0_13, %c0_14], %42 {strides = array<i32>} : memref<8x128xf32, #tpu.memory_space<vmem>>, vector<8x128xf32>,
    return
  }
  func.func @transform_0(%arg0: i32) -> (i32, i32) {
    %c0_i32 = arith.constant 0 : i32
    %c0_i32_0 = arith.constant 0 : i32
    return %arg0, %c0_i32 : i32, i32
  }
  func.func @transform_1(%arg0: i32) -> (i32, i32) {
    %c0_i32 = arith.constant 0 : i32
    %c0_i32_0 = arith.constant 0 : i32
    return %arg0, %c0_i32 : i32, i32
  }
}

</mosaic_0001>

<bundles_post_ra>
// kernel: gelu.1
= control target key start
LH: loop header
LB: loop body
LE: loop exit
PB: predicated region body
PF: predicated region fallthrough
CT: control target
= control target key end

     0   :  { %s236_s6 = smov 0   ;;  %s260_s0 = inlined_call_operand.vmem [shape: f32[16,128], index: 0, kind: input, shape index: {}]   ;;  %s261_s1 = inlined_call_operand.vmem [shape: f32[16,128], index: 1, kind: output, shape index: {}]  }
   0x1 LB: > { %s197_s7 = sadd.s32 4294967295, %s224_s6   ;;  %p201_p0 = scmp.ge.s32.totalorder %s224_s6, 1  ;;  %s224_s6 = sphi %s236_s6, %s11_s6  }
   0x2   : > { %p86_p1 = scmp.lt.s32.totalorder %s224_s6, 3 }
   0x4   : > { %p87_p2 = pnand %p201_p0, %p86_p1 }
   0x5   : > { %p104_p3 = scmp.lt.s32.totalorder (!%p87_p2), %s197_s7, 1 }
   0x6   : > { %90 = sbr.rel (%p87_p2) target bundleno = 77 (0x4d), region = 24 }
   0xb   : > { %s263_s7 = smov (!%p104_p3, %s197_s7), 1 }
   0xc   : > { %s202_s8 = sshll.u32 %s263_s7, 3 }
   0xd   : > { %s107_s11 = scalar_lea.vmem %s260_s0, %s202_s8  ;;  %s111_s14 = scalar_lea.vmem %s261_s1, %s202_s8 }
   0xe   : > { %v112_v0 = vld [vmem:[%s107_s11] sm:$0xff] }
   0xf   : > { %v113_v1 = vand.u32 2147483647, %v112_v0  ;;  %vm140_vm0 = vcmp.ge.f32.partialorder %v112_v0, 0.0 }
  0x11   : > { %v114_v2 = vmul.f32 0.70710677, %v113_v1 }
  0x13   : > { %v115_v3 = vmul.f32 0.3275911, %v114_v2  ;;  %v133_v8 = vmul.f32 %v114_v2, %v114_v2 }
  0x15   : > { %v116_v4 = vadd.f32 1.0, %v115_v3  ;;  %v134_v11 = vsub.f32 0.0, %v133_v8 }
  0x17   : > { %214 = vrcp.f32 %v116_v4  ;;  %v135_v14 = vmul.f32 1.442695, %v134_v11 }
  0x19   : > { %216 = vpow2.f32 %v135_v14 }
  0x24   : > { %v215_v5 = vpop.eup %214 }
  0x25   : > { %v118_v6 = vmul.f32 %v215_v5, %v116_v4 }
  0x26   : > { %v217_v23 = vpop.eup %216 }
  0x27   : > { %v119_v7 = vsub.f32 2.0, %v118_v6 }
  0x29   : > { %v120_v9 = vmul.f32 %v215_v5, %v119_v7 }
  0x2b   : > { %v121_v10 = vmul.f32 %v120_v9, %v116_v4 }
  0x2d   : > { %v122_v12 = vsub.f32 2.0, %v121_v10 }
  0x2f   : > { %v123_v13 = vmul.f32 %v122_v12, %v120_v9 }
  0x31   : > { %v124_v15 = vmul.f32 1.0614054, %v123_v13 }
  0x33   : > { %v125_v16 = vadd.f32 -1.4531521, %v124_v15 }
  0x35   : > { %v126_v17 = vmul.f32 %v125_v16, %v123_v13 }
  0x37   : > { %v127_v18 = vadd.f32 1.4214138, %v126_v17 }
  0x39   : > { %v128_v19 = vmul.f32 %v127_v18, %v123_v13 }
  0x3b   : > { %v129_v20 = vadd.f32 -0.28449672, %v128_v19 }
  0x3d   : > { %v130_v21 = vmul.f32 %v129_v20, %v123_v13 }
  0x3f   : > { %v131_v22 = vadd.f32 0.2548296, %v130_v21 }
  0x41   : > { %v132_v24 = vmul.f32 %v131_v22, %v123_v13 }
  0x43   : > { %v137_v25 = vmul.f32 %v217_v23, %v132_v24 }
  0x45   : > { %v138_v26 = vmul.f32 0.5, %v137_v25 }
  0x47   : > { %v139_v27 = vmul.f32 %v138_v26, %v112_v0 }
  0x49   : > { %v141_v28 = vsub.f32 %v112_v0, %v139_v27 }
  0x4b   : > { %v142_v29 = vsel %vm140_vm0, %v141_v28, %v139_v27 }
  0x4c   : > { %143 = vst [vmem:[%s111_s14] sm:$0xff] %v142_v29 }
  0x4d PF: > { %s11_s6 = sadd.s32 1, %s224_s6  }
  0x4e   : > { %p8_p4 = scmp.ge.s32.totalorder %s11_s6, 4  }
  0x50   :  { %10 = sbr.rel (!%p8_p4) target bundleno = 1 (0x1), region = 54 }

</bundles_post_ra>
